<compile_context>
chip_gen: v7x
topology: tpu7x:2x2x1
jax: 0.10.0
libtpu: 0.0.40
codegen_flags: <defaults>
</compile_context>

<pallas_src>
import functools

import jax
import jax.numpy as jnp
from jax.experimental import pallas as pl
from jax.experimental.pallas import tpu as pltpu


def cim_kernel(x_ref, w1_ref, b1_ref, g_ref, beta_ref, w2_ref, b2_ref, o_ref,
               *, hw, hw_pad):
    # x_ref block: (Bt, C, HWp) -- channels on sublanes, spatial on lanes.
    x = x_ref[...]

    # Adaptive avg + max pooling over the spatial (lane) axis -> (Bt, C).
    if hw_pad == hw:
        y = jnp.sum(x, axis=-1) * (1.0 / hw) + jnp.max(x, axis=-1)
    else:
        # Wrapper zero-pads the lane axis: zeros are harmless for the sum
        # (divide by the true hw), but the max must ignore padded lanes.
        lane = jax.lax.broadcasted_iota(jnp.int32, x.shape, dimension=2)
        x_for_max = jnp.where(lane < hw, x, -jnp.inf)
        y = jnp.sum(x, axis=-1) * (1.0 / hw) + jnp.max(x_for_max, axis=-1)

    # Linear(C -> Hid)
    h = jnp.dot(y, w1_ref[...], preferred_element_type=jnp.float32) + b1_ref[...]

    # LayerNorm over the hidden dim (eps matches nn.LayerNorm default).
    mu = jnp.mean(h, axis=-1, keepdims=True)
    var = jnp.mean((h - mu) ** 2, axis=-1, keepdims=True)
    h = (h - mu) * jax.lax.rsqrt(var + 1e-5)
    h = h * g_ref[...] + beta_ref[...]

    # ReLU
    h = jnp.maximum(h, 0.0)

    # Linear(Hid -> C) + Sigmoid -> per-(batch, channel) scale (Bt, C).
    z = jnp.dot(h, w2_ref[...], preferred_element_type=jnp.float32) + b2_ref[...]
    s = jax.nn.sigmoid(z)

    # Channel-wise re-scale; (Bt, C, 1) broadcasts over the HW lane axis.
    # Re-read the tile from VMEM (vld slots are plentiful) instead of keeping
    # the pooling operand live in vregs across the matmuls (avoids spills for
    # larger tiles).
    o_ref[...] = (x_ref[...] * s[:, :, None]).astype(o_ref.dtype)


def _tile_policy():
    """Generation-aware tiling policy."""
    kind = ""
    try:
        kind = jax.devices()[0].device_kind.lower()
    except Exception:
        pass
    vmem_cap = 128 << 20
    try:
        vmem_cap = int(pltpu.get_tpu_info().vmem_capacity_bytes)
    except Exception:
        pass

    if "v7" in kind or vmem_cap <= (80 << 20):
        # v7x: ~3.2 TB/s per TC, 64 MiB physical VMEM, 2 TCs. Bigger tiles to
        # amortize the ~0.35us/step cost; >= 4 grid steps per TC so input DMA,
        # compute and output writeback overlap in steady state.
        return dict(target_bytes=5 << 20, min_steps=8,
                    vmem_budget=28 << 20, vmem_cap=vmem_cap)
    if "v5 lite" in kind or "v5e" in kind or "v5lite" in kind:
        # v5e: 0.82 TB/s HBM, 16 MiB default scoped VMEM. ~2 MiB tiles already
        # keep the per-step overhead < 10%; don't risk the scoped default.
        return dict(target_bytes=2 << 20, min_steps=1,
                    vmem_budget=16 << 20, vmem_cap=vmem_cap)
    # v6e (and fallback): 1.3-1.4 TB/s, 128 MiB VMEM, 32 MiB default scoped.
    return dict(target_bytes=4 << 20, min_steps=1,
                vmem_budget=24 << 20, vmem_cap=vmem_cap)


def _pick_batch_tile(b, bytes_per_batch, target_bytes, min_steps):
    """Batch-tile near the byte target. No divisor-of-B restriction: the grid
    uses cdiv and Pallas discards the ragged last block's overhang rows."""
    bt = max(1, min(b, target_bytes // max(1, bytes_per_batch)))
    want_steps = min(b, min_steps)
    if want_steps > 1:
        bt = min(bt, max(1, b // want_steps))
    return bt


def enhanced_cim_pallas(x_nchw, w1, b1, gamma, beta, w2, b2):
    b, c, h, w = x_nchw.shape
    hw = h * w
    hid = w1.shape[1]

    # Free view: NCHW -> (B, C, HW). No data movement (unlike an NHWC transpose).
    x_flat = x_nchw.reshape(b, c, hw)

    # Lane-dense blocks: pad HW to a multiple of 128 so every store is an
    # unmasked full-lane vst and pooling layout is well defined. The pad (and
    # slice back) costs one extra HBM round trip, so it only happens when HW
    # is not already lane aligned (here HW=256, so it's a no-op).
    hw_pad = pl.cdiv(hw, 128) * 128
    if hw_pad != hw:
        x_flat = jnp.pad(x_flat, ((0, 0), (0, 0), (0, hw_pad - hw)))

    policy = _tile_policy()
    bytes_per_batch = hw_pad * c * x_flat.dtype.itemsize
    bt = _pick_batch_tile(b, bytes_per_batch, policy["target_bytes"],
                          policy["min_steps"])
    grid = (pl.cdiv(b, bt),)

    # Explicit scoped-VMEM budget: 2 input + 2 output buffers of one tile,
    # double-buffered (tiny) weights, plus compiler-scratch headroom.
    tile_bytes = bt * bytes_per_batch
    weight_bytes = (c * hid * 2 + 4 * hid + 2 * c) * 4
    vmem_limit = max(policy["vmem_budget"],
                     4 * tile_bytes + 2 * weight_bytes + (2 << 20))
    vmem_limit = min(vmem_limit, policy["vmem_cap"] - (4 << 20))
    # TODO(synk): for extreme spatial sizes where even bt=1 exceeds this budget,
    # a split pool/rescale two-pass structure would be needed; not required here.

    # Advisory cost hint: the op is HBM-bandwidth bound (x read once, written once).
    cost = pl.CostEstimate(
        flops=2 * b * hw * c + 4 * b * c * hid,
        transcendentals=b * (c + hid),
        bytes_accessed=2 * b * hw_pad * c * x_flat.dtype.itemsize + weight_bytes,
    )

    kernel = functools.partial(cim_kernel, hw=hw, hw_pad=hw_pad)

    out_flat = pl.pallas_call(
        kernel,
        out_shape=jax.ShapeDtypeStruct((b, c, hw_pad), x_flat.dtype),
        grid_spec=pltpu.PrefetchScalarGridSpec(
            num_scalar_prefetch=0,
            grid=grid,
            in_specs=[
                pl.BlockSpec((bt, c, hw_pad), lambda i: (i, 0, 0)),  # x tile
                pl.BlockSpec((c, hid), lambda i: (0, 0)),            # W1 (in, out)
                pl.BlockSpec((1, hid), lambda i: (0, 0)),            # b1
                pl.BlockSpec((1, hid), lambda i: (0, 0)),            # LN gamma
                pl.BlockSpec((1, hid), lambda i: (0, 0)),            # LN beta
                pl.BlockSpec((hid, c), lambda i: (0, 0)),            # W2 (in, out)
                pl.BlockSpec((1, c), lambda i: (0, 0)),              # b2
            ],
            out_specs=pl.BlockSpec((bt, c, hw_pad), lambda i: (i, 0, 0)),
        ),
        compiler_params=pltpu.CompilerParams(
            dimension_semantics=("parallel",),
            vmem_limit_bytes=int(vmem_limit),
        ),
        cost_estimate=cost,
    )(x_flat, w1, b1, gamma, beta, w2, b2)

    if hw_pad != hw:
        out_flat = out_flat[:, :, :hw]

    # Free view back: (B, C, HW) -> NCHW.
    return out_flat.reshape(b, c, h, w)


def enhanced_cim_ref(x_nchw, w1, b1, gamma, beta, w2, b2):
    """Pure-JAX reference mirroring the PyTorch forward:
    y = avg_pool(x) + max_pool(x); s = sigmoid(fc2(relu(ln(fc1(y))))); out = x*s."""
    y_avg = jnp.mean(x_nchw, axis=(2, 3))
    y_max = jnp.max(x_nchw, axis=(2, 3))
    y = y_avg + y_max
    h = y @ w1 + b1[0]
    mu = jnp.mean(h, axis=-1, keepdims=True)
    var = jnp.mean((h - mu) ** 2, axis=-1, keepdims=True)
    h = (h - mu) / jnp.sqrt(var + 1e-5) * gamma[0] + beta[0]
    h = jnp.maximum(h, 0.0)
    s = jax.nn.sigmoid(h @ w2 + b2[0])
    return x_nchw * s[:, :, None, None]


if __name__ == "__main__":
    # Small shapes consistent with the module: channels must be >= reduction_ratio.
    B, C, H, W = 2, 64, 16, 16
    reduction_ratio = 16
    HID = C // reduction_ratio  # 4

    key = jax.random.PRNGKey(0)
    kx, k1, k2, k3, k4 = jax.random.split(key, 5)

    x = jax.random.normal(kx, (B, C, H, W), dtype=jnp.float32)

    # Weights stored as (in, out), so y @ W matches PyTorch's x @ W.T.
    w1 = 0.1 * jax.random.normal(k1, (C, HID), dtype=jnp.float32)
    b1 = 0.05 * jax.random.normal(k2, (1, HID), dtype=jnp.float32)
    gamma = jnp.ones((1, HID), dtype=jnp.float32)
    beta = jnp.zeros((1, HID), dtype=jnp.float32)
    w2 = 0.1 * jax.random.normal(k3, (HID, C), dtype=jnp.float32)
    b2 = 0.05 * jax.random.normal(k4, (1, C), dtype=jnp.float32)

    out = enhanced_cim_pallas(x, w1, b1, gamma, beta, w2, b2)
    out = jax.block_until_ready(out)

    ref = enhanced_cim_ref(x, w1, b1, gamma, beta, w2, b2)
    ref = jax.block_until_ready(ref)

    assert out.shape == (B, C, H, W)
    assert jnp.allclose(out, ref, atol=1e-4, rtol=1e-4), "mismatch vs reference"

    print("KERNEL_OK")
</pallas_src>

<mosaic_0001>
module attributes {stable_mosaic.version = 11 : i64} {
  func.func @cim_kernel(%arg0: i32, %arg1: memref<2x64x256xf32, #tpu.memory_space<vmem>>, %arg2: memref<64x4xf32, #tpu.memory_space<vmem>>, %arg3: memref<1x4xf32, #tpu.memory_space<vmem>>, %arg4: memref<1x4xf32, #tpu.memory_space<vmem>>, %arg5: memref<1x4xf32, #tpu.memory_space<vmem>>, %arg6: memref<4x64xf32, #tpu.memory_space<vmem>>, %arg7: memref<1x64xf32, #tpu.memory_space<vmem>>, %arg8: memref<2x64x256xf32, #tpu.memory_space<vmem>>) attributes {dimension_semantics = [#tpu.dimension_semantics<parallel>], iteration_bounds = array<i64: 1>, scalar_prefetch = 0 : i64, scratch_operands = 0 : i64, tpu.core_type = #tpu.core_type<tc>, window_params = [{transform_indices = @transform_0, window_bounds = array<i64: 2, 64, 256>}, {pipeline_mode = #tpu.pipeline_mode<synchronous>, transform_indices = @transform_1, window_bounds = array<i64: 64, 4>}, {pipeline_mode = #tpu.pipeline_mode<synchronous>, transform_indices = @transform_2, window_bounds = array<i64: 1, 4>}, {pipeline_mode = #tpu.pipeline_mode<synchronous>, transform_indices = @transform_3, window_bounds = array<i64: 1, 4>}, {pipeline_mode = #tpu.pipeline_mode<synchronous>, transform_indices = @transform_4, window_bounds = array<i64: 1, 4>}, {pipeline_mode = #tpu.pipeline_mode<synchronous>, transform_indices = @transform_5, window_bounds = array<i64: 4, 64>}, {pipeline_mode = #tpu.pipeline_mode<synchronous>, transform_indices = @transform_6, window_bounds = array<i64: 1, 64>}, {transform_indices = @transform_7, window_bounds = array<i64: 2, 64, 256>}]} {
    %c0 = arith.constant 0 : index
    %c0_0 = arith.constant 0 : index
    %c0_1 = arith.constant 0 : index
    %0 = vector.load %arg1[%c0, %c0_0, %c0_1] : memref<2x64x256xf32, #tpu.memory_space<vmem>>, vector<2x64x256xf32>
    %cst = arith.constant dense<0.000000e+00> : vector<2x64xf32>
    %1 = vector.multi_reduction <add>, %0, %cst [2] : vector<2x64x256xf32> to vector<2x64xf32>
    %cst_2 = arith.constant 3.906250e-03 : f32
    %2 = vector.broadcast %cst_2 : f32 to vector<2x64xf32>
    %3 = arith.mulf %1, %2 : vector<2x64xf32>
    %cst_3 = arith.constant dense<0xFF800000> : vector<2x64xf32>
    %4 = vector.multi_reduction <maximumf>, %0, %cst_3 [2] : vector<2x64x256xf32> to vector<2x64xf32>
    %5 = arith.addf %3, %4 : vector<2x64xf32>
    %c0_4 = arith.constant 0 : index
    %c0_5 = arith.constant 0 : index
    %6 = vector.load %arg2[%c0_4, %c0_5] : memref<64x4xf32, #tpu.memory_space<vmem>>, vector<64x4xf32>
    %cst_6 = arith.constant dense<0.000000e+00> : vector<2x4xf32>
    %7 = tpu.matmul %5, %6, %cst_6 {dimension_numbers = #tpu.dot_dimension_numbers<[1], [0], [0], [1], [0, 0, 1, 1], [], []>} : vector<2x64xf32>, vector<64x4xf32>, vector<2x4xf32> -> vector<2x4xf32>
    %c0_7 = arith.constant 0 : index
    %c0_8 = arith.constant 0 : index
    %8 = vector.load %arg3[%c0_7, %c0_8] : memref<1x4xf32, #tpu.memory_space<vmem>>, vector<1x4xf32>
    %9 = vector.broadcast %8 : vector<1x4xf32> to vector<2x4xf32>
    %10 = arith.addf %7, %9 : vector<2x4xf32>
    %cst_9 = arith.constant dense<0.000000e+00> : vector<2xf32>
    %11 = vector.multi_reduction <add>, %10, %cst_9 [1] : vector<2x4xf32> to vector<2xf32>
    %12 = vector.shape_cast %11 : vector<2xf32> to vector<2x1xf32>
    %cst_10 = arith.constant 4.000000e+00 : f32
    %13 = vector.broadcast %cst_10 : f32 to vector<2x1xf32>
    %14 = arith.divf %12, %13 : vector<2x1xf32>
    %15 = vector.broadcast %14 : vector<2x1xf32> to vector<2x4xf32>
    %16 = arith.subf %10, %15 : vector<2x4xf32>
    %17 = arith.mulf %16, %16 : vector<2x4xf32>
    %cst_11 = arith.constant dense<0.000000e+00> : vector<2xf32>
    %18 = vector.multi_reduction <add>, %17, %cst_11 [1] : vector<2x4xf32> to vector<2xf32>
    %19 = vector.shape_cast %18 : vector<2xf32> to vector<2x1xf32>
    %cst_12 = arith.constant 4.000000e+00 : f32
    %20 = vector.broadcast %cst_12 : f32 to vector<2x1xf32>
    %21 = arith.divf %19, %20 : vector<2x1xf32>
    %22 = vector.broadcast %14 : vector<2x1xf32> to vector<2x4xf32>
    %23 = arith.subf %10, %22 : vector<2x4xf32>
    %cst_13 = arith.constant 9.99999974E-6 : f32
    %24 = vector.broadcast %cst_13 : f32 to vector<2x1xf32>
    %25 = arith.addf %21, %24 : vector<2x1xf32>
    %26 = math.rsqrt %25 : vector<2x1xf32>
    %27 = vector.broadcast %26 : vector<2x1xf32> to vector<2x4xf32>
    %28 = arith.mulf %23, %27 : vector<2x4xf32>
    %c0_14 = arith.constant 0 : index
    %c0_15 = arith.constant 0 : index
    %29 = vector.load %arg4[%c0_14, %c0_15] : memref<1x4xf32, #tpu.memory_space<vmem>>, vector<1x4xf32>
    %30 = vector.broadcast %29 : vector<1x4xf32> to vector<2x4xf32>
    %31 = arith.mulf %28, %30 : vector<2x4xf32>
    %c0_16 = arith.constant 0 : index
    %c0_17 = arith.constant 0 : index
    %32 = vector.load %arg5[%c0_16, %c0_17] : memref<1x4xf32, #tpu.memory_space<vmem>>, vector<1x4xf32>
    %33 = vector.broadcast %32 : vector<1x4xf32> to vector<2x4xf32>
    %34 = arith.addf %31, %33 : vector<2x4xf32>
    %cst_18 = arith.constant 0.000000e+00 : f32
    %35 = vector.broadcast %cst_18 : f32 to vector<2x4xf32>
    %36 = arith.maximumf %34, %35 : vector<2x4xf32>
    %c0_19 = arith.constant 0 : index
    %c0_20 = arith.constant 0 : index
    %37 = vector.load %arg6[%c0_19, %c0_20] : memref<4x64xf32, #tpu.memory_space<vmem>>, vector<4x64xf32>
    %cst_21 = arith.constant dense<0.000000e+00> : vector<2x64xf32>
    %38 = tpu.matmul %36, %37, %cst_21 {dimension_numbers = #tpu.dot_dimension_numbers<[1], [0], [0], [1], [0, 0, 1, 1], [], []>} : vector<2x4xf32>, vector<4x64xf32>, vector<2x64xf32> -> vector<2x64xf32>
    %c0_22 = arith.constant 0 : index
    %c0_23 = arith.constant 0 : index
    %39 = vector.load %arg7[%c0_22, %c0_23] : memref<1x64xf32, #tpu.memory_space<vmem>>, vector<1x64xf32>
    %40 = vector.broadcast %39 : vector<1x64xf32> to vector<2x64xf32>
    %41 = arith.addf %38, %40 : vector<2x64xf32>
    %42 = arith.negf %41 : vector<2x64xf32>
    %43 = math.exp %42 : vector<2x64xf32>
    %cst_24 = arith.constant 1.000000e+00 : f32
    %44 = vector.broadcast %cst_24 : f32 to vector<2x64xf32>
    %45 = arith.addf %44, %43 : vector<2x64xf32>
    %46 = arith.divf %44, %45 : vector<2x64xf32>
    %c0_25 = arith.constant 0 : index
    %c0_26 = arith.constant 0 : index
    %c0_27 = arith.constant 0 : index
    %47 = vector.load %arg1[%c0_25, %c0_26, %c0_27] : memref<2x64x256xf32, #tpu.memory_space<vmem>>, vector<2x64x256xf32>
    %48 = vector.shape_cast %46 : vector<2x64xf32> to vector<2x64x1xf32>
    %49 = vector.broadcast %48 : vector<2x64x1xf32> to vector<2x64x256xf32>
    %50 = arith.mulf %47, %49 : vector<2x64x256xf32>
    %c0_28 = arith.constant 0 : index
    %c0_29 = arith.constant 0 : index
    %c0_30 = arith.constant 0 : index
    %51 = vector.load %arg8[%c0_28, %c0_29, %c0_30] : memref<2x64x256xf32, #tpu.memory_space<vmem>>, vector<2x64x256xf32>
    tpu.vector_store %arg8[%c0_28, %c0_29, %c0_30], %50 {strides = array<i32>} : memref<2x64x256xf32, #tpu.memory_space<vmem>>, vector<2x64x256xf32>,
    return
  }
  func.func @transform_0(%arg0: i32) -> (i32, i32, i32) {
    %c0_i32 = arith.constant 0 : i32
    %c0_i32_0 = arith.constant 0 : i32
    %c0_i32_1 = arith.constant 0 : i32
    return %arg0, %c0_i32, %c0_i32_0 : i32, i32, i32
  }
  func.func @transform_1(%arg0: i32) -> (i32, i32) {
    %c0_i32 = arith.constant 0 : i32
    %c0_i32_0 = arith.constant 0 : i32
    %c0_i32_1 = arith.constant 0 : i32
    return %c0_i32, %c0_i32_0 : i32, i32
  }
  func.func @transform_2(%arg0: i32) -> (i32, i32) {
    %c0_i32 = arith.constant 0 : i32
    %c0_i32_0 = arith.constant 0 : i32
    %c0_i32_1 = arith.constant 0 : i32
    return %c0_i32, %c0_i32_0 : i32, i32
  }
  func.func @transform_3(%arg0: i32) -> (i32, i32) {
    %c0_i32 = arith.constant 0 : i32
    %c0_i32_0 = arith.constant 0 : i32
    %c0_i32_1 = arith.constant 0 : i32
    return %c0_i32, %c0_i32_0 : i32, i32
  }
  func.func @transform_4(%arg0: i32) -> (i32, i32) {
    %c0_i32 = arith.constant 0 : i32
    %c0_i32_0 = arith.constant 0 : i32
    %c0_i32_1 = arith.constant 0 : i32
    return %c0_i32, %c0_i32_0 : i32, i32
  }
  func.func @transform_5(%arg0: i32) -> (i32, i32) {
    %c0_i32 = arith.constant 0 : i32
    %c0_i32_0 = arith.constant 0 : i32
    %c0_i32_1 = arith.constant 0 : i32
    return %c0_i32, %c0_i32_0 : i32, i32
  }
  func.func @transform_6(%arg0: i32) -> (i32, i32) {
    %c0_i32 = arith.constant 0 : i32
    %c0_i32_0 = arith.constant 0 : i32
    %c0_i32_1 = arith.constant 0 : i32
    return %c0_i32, %c0_i32_0 : i32, i32
  }
  func.func @transform_7(%arg0: i32) -> (i32, i32, i32) {
    %c0_i32 = arith.constant 0 : i32
    %c0_i32_0 = arith.constant 0 : i32
    %c0_i32_1 = arith.constant 0 : i32
    return %arg0, %c0_i32, %c0_i32_0 : i32, i32, i32
  }
}

</mosaic_0001>

<bundles_post_ra>
// kernel: tpu_custom_call.1
= control target key start
LH: loop header
LB: loop body
LE: loop exit
PB: predicated region body
PF: predicated region fallthrough
CT: control target
= control target key end

     0   :  { %12 = vsyncpa [#allocation3], 0  ;;  %s1108_s0 = inlined_call_operand.hbm [shape: f32[2,64,256], index: 0, kind: input, shape index: {}]   ;;  %s1109_s1 = inlined_call_operand.vmem [shape: f32[64,4], index: 1, kind: input, shape index: {}]   ;;  %s1110_s2 = inlined_call_operand.vmem [shape: f32[1,4], index: 2, kind: input, shape index: {}]   ;;  %s1111_s3 = inlined_call_operand.vmem [shape: f32[1,4], index: 3, kind: input, shape index: {}]   ;;  %s1112_s4 = inlined_call_operand.vmem [shape: f32[1,4], index: 4, kind: input, shape index: {}]   ;;  %s1113_s5 = inlined_call_operand.vmem [shape: f32[4,64], index: 5, kind: input, shape index: {}]   ;;  %s1114_s6 = inlined_call_operand.vmem [shape: f32[1,64], index: 6, kind: input, shape index: {}]   ;;  %s1115_s7 = inlined_call_operand.hbm [shape: f32[2,64,256], index: 7, kind: output, shape index: {}]  }
   0x1   :  { %13 = vsyncpa [#allocation4], 0  ;;  %s792_s24 = smov [#allocation2]   ;;  %s744_s28 = scalar_lea.hbm %s1108_s0, 4096 }
   0x2   :  { %s19_s25 = sshll.u32 %s792_s24, 4  ;;  %p745_p0 = scmp.ne.s32.totalorder %s1108_s0, %s744_s28  ;;  %s20_s25 = int_to_ptr.vmem [resolvable:$true] %s19_s25 }
   0x3   :  { %p748_p1 = scmp.lt.u32.totalorder %s744_s28, %s1108_s0 }
   0x5   :  { %p750_p2 = pnand %p748_p1, %p745_p0 }
   0x7   :  { %753 = shalt.err (!%p750_p2)
}
   0x8   :  { %s754_s10 = scalar_lea.vmem %s20_s25, 4096  ;;  %p759_p4 = scmp.lt.s32.totalorder %s20_s25, %s20_s25 }
   0x9   :  { %p755_p3 = scmp.ne.s32.totalorder %s20_s25, %s754_s10  ;;  %p760_p5 = scmp.lt.s32.totalorder %s754_s10, %s754_s10 }
   0xb   :  { %p761_p6 = por %p760_p5, %p759_p4 }
   0xd   :  { %p762_p7 = pnand %p761_p6, %p755_p3 }
   0xf   :  { %765 = shalt.err (!%p762_p7)
}
  0x10   :  { %s793_s11 = smov 256   ;;  %s794_s12 = smov 16  }
  0x11   :  { %25 = dma.hbm_to_vmem [thread:$0]  %s1108_s0, 4096, %s20_s25, [#allocation3], %s793_s11, %s793_s11, %s794_s12  }
  0x12   :  { %788 = dma.done.wait [#allocation3], 4096  }
  0x13   :  { %789 = vsyncadd [#allocation3], 4294963200  ;;  %v854_v0 = vld [vmem:[#allocation2 + $0x80] sm:$0xff]  ;;  %v856_v1 = vld [vmem:[#allocation2 + $0x88] sm:$0xff]  ;;  %vm796_vm0 = vmmov 0   ;;  %vm243_vm1 = vcmask 130112  }
  0x14   :  { %1134 = vst [vmem:[#allocation8_spill] sm:$0xff] %v854_v0  ;;  %1135 = vst [vmem:[#allocation9_spill] sm:$0xff] %v856_v1  ;;  %v858_v2 = vld [vmem:[#allocation2] sm:$0xff]  ;;  %v97_v3 = vadd.f32 %v856_v1, %v854_v0  ;;  %v862_v4 = vld [vmem:[#allocation2 + $0x8] sm:$0xff]  ;;  %v161_v27 = vmax.f32 %v854_v0, %v856_v1  ;;  %vm250_vm2 = vcmask 195712   ;;  %vm257_vm3 = vcmask 261312  }
  0x15   :  { %v864_v5 = vld [vmem:[#allocation2 + $0x90] sm:$0xff]  ;;  %v866_v6 = vld [vmem:[#allocation2 + $0x98] sm:$0xff]  ;;  %v73_v7 = vadd.f32 %v862_v4, %v858_v2  ;;  %v878_v12 = vld [vmem:[#allocation2 + $0xa0] sm:$0xff]  ;;  %v137_v25 = vmax.f32 %v858_v2, %v862_v4  ;;  %vm264_vm4 = vcmask 326912   ;;  %vm271_vm5 = vcmask 392512  }
  0x16   :  { %1136 = vst [vmem:[#allocation10_spill] sm:$0xff] %v864_v5  ;;  %1137 = vst [vmem:[#allocation11_spill] sm:$0xff] %v866_v6  ;;  %v870_v8 = vld [vmem:[#allocation2 + $0x10] sm:$0xff]  ;;  %v872_v9 = vld [vmem:[#allocation2 + $0x18] sm:$0xff]  ;;  %98 = vadd.xlane.f32.xlu1 %v97_v3  ;;  %v100_v10 = vadd.f32 %v866_v6, %v864_v5  ;;  %v164_v26 = vmax.f32 %v864_v5, %v866_v6  ;;  %vm278_vm6 = vcmask 458112   ;;  %vm285_vm7 = vcmask 523712  }
  0x17   :  { %74 = vadd.xlane.f32.xlu0 %v73_v7  ;;  %v76_v11 = vadd.f32 %v872_v9, %v870_v8  ;;  %1138 = vst [vmem:[#allocation12_spill] sm:$0xff] %v878_v12  ;;  %v880_v13 = vld [vmem:[#allocation2 + $0xa8] sm:$0xff]  ;;  %v882_v14 = vld [vmem:[#allocation2 + $0x20] sm:$0xff]  ;;  %v890_v18 = vld [vmem:[#allocation2 + $0xb0] sm:$0xff]  ;;  %v140_v24 = vmax.f32 %v870_v8, %v872_v9  ;;  %vm326_vm8 = vcmask 1041409   ;;  %vm328_vm9 = vcmask 523264  }
  0x18   :  { %1139 = vst [vmem:[#allocation13_spill] sm:$0xff] %v880_v13  ;;  %v884_v15 = vld [vmem:[#allocation2 + $0x28] sm:$0xff]  ;;  %v103_v16 = vadd.f32 %v880_v13, %v878_v12  ;;  %1140 = vst [vmem:[#allocation14_spill] sm:$0xff] %v890_v18  ;;  %v892_v19 = vld [vmem:[#allocation2 + $0xb8] sm:$0xff]  ;;  %v167_v34 = vmax.f32 %v878_v12, %v880_v13  ;;  %vm401_vm10 = vcmask 25600   ;;  %vm445_vm11 = vcmask 1043456  }
  0x19   :  { %v79_v17 = vadd.f32 %v884_v15, %v882_v14  ;;  %1141 = vst [vmem:[#allocation15_spill] sm:$0xff] %v892_v19  ;;  %v894_v20 = vld [vmem:[#allocation2 + $0x30] sm:$0xff]  ;;  %v896_v21 = vld [vmem:[#allocation2 + $0x38] sm:$0xff]  ;;  %v106_v22 = vadd.f32 %v892_v19, %v890_v18  ;;  %v910_v28 = vld [vmem:[#allocation2 + $0xc0] sm:$0xff]  ;;  %v143_v35 = vmax.f32 %v882_v14, %v884_v15  ;;  %v170_v42 = vmax.f32 %v890_v18, %v892_v19 }
  0x1a   :  { %101 = vadd.xlane.f32.xlu1 %v100_v10  ;;  %v82_v23 = vadd.f32 %v896_v21, %v894_v20  ;;  %1142 = vst [vmem:[#allocation16_spill] sm:$0xff] %v910_v28  ;;  %v912_v29 = vld [vmem:[#allocation2 + $0xc8] sm:$0xff]  ;;  %v914_v30 = vld [vmem:[#allocation2 + $0x40] sm:$0xff]  ;;  %v926_v36 = vld [vmem:[#allocation2 + $0xd0] sm:$0xff]  ;;  %v146_v43 = vmax.f32 %v894_v20, %v896_v21  ;;  %v795_v10 = vmov 0.0|0.0   ;;  %vm441_vm12 = vcmask 31744  }
  0x1b   :  { %77 = vadd.xlane.f32.xlu0 %v76_v11  ;;  %1143 = vst [vmem:[#allocation17_spill] sm:$0xff] %v912_v29  ;;  %v916_v31 = vld [vmem:[#allocation2 + $0x48] sm:$0xff]  ;;  %v109_v32 = vadd.f32 %v912_v29, %v910_v28  ;;  %1144 = vst [vmem:[#allocation18_spill] sm:$0xff] %v926_v36  ;;  %v928_v37 = vld [vmem:[#allocation2 + $0xd8] sm:$0xff]  ;;  %v173_v50 = vmax.f32 %v910_v28, %v912_v29  ;;  %719 = vmatprep.subr.bf16.mxu0 %v795_v10 }
  0x1c   :  { %v85_v33 = vadd.f32 %v916_v31, %v914_v30  ;;  %1145 = vst [vmem:[#allocation19_spill] sm:$0xff] %v928_v37  ;;  %v930_v38 = vld [vmem:[#allocation2 + $0x50] sm:$0xff]  ;;  %v932_v39 = vld [vmem:[#allocation2 + $0x58] sm:$0xff]  ;;  %v112_v40 = vadd.f32 %v928_v37, %v926_v36  ;;  %v942_v44 = vld [vmem:[#allocation2 + $0xe0] sm:$0xff]  ;;  %v149_v51 = vmax.f32 %v914_v30, %v916_v31  ;;  %v176_v58 = vmax.f32 %v926_v36, %v928_v37 }
  0x1d   :  { %v88_v41 = vadd.f32 %v932_v39, %v930_v38  ;;  %1146 = vst [vmem:[#allocation20_spill] sm:$0xff] %v942_v44  ;;  %v944_v45 = vld [vmem:[#allocation2 + $0xe8] sm:$0xff]  ;;  %v946_v46 = vld [vmem:[#allocation2 + $0x60] sm:$0xff]  ;;  %v958_v52 = vld [vmem:[#allocation2 + $0xf0] sm:$0xff]  ;;  %v152_v59 = vmax.f32 %v930_v38, %v932_v39 }
  0x1e   :  { %104 = vadd.xlane.f32.xlu1 %v103_v16  ;;  %1147 = vst [vmem:[#allocation21_spill] sm:$0xff] %v944_v45  ;;  %v948_v47 = vld [vmem:[#allocation2 + $0x68] sm:$0xff]  ;;  %v115_v48 = vadd.f32 %v944_v45, %v942_v44  ;;  %1148 = vst [vmem:[#allocation22_spill] sm:$0xff] %v958_v52  ;;  %v960_v53 = vld [vmem:[#allocation2 + $0xf8] sm:$0xff]  ;;  %v179_v60 = vmax.f32 %v942_v44, %v944_v45 }
  0x1f   :  { %80 = vadd.xlane.f32.xlu0 %v79_v17  ;;  %v91_v49 = vadd.f32 %v948_v47, %v946_v46  ;;  %1149 = vst [vmem:[#allocation23_spill] sm:$0xff] %v960_v53  ;;  %v962_v54 = vld [vmem:[#allocation2 + $0x70] sm:$0xff]  ;;  %v964_v55 = vld [vmem:[#allocation2 + $0x78] sm:$0xff]  ;;  %v118_v56 = vadd.f32 %v960_v53, %v958_v52  ;;  %v155_v61 = vmax.f32 %v946_v46, %v948_v47  ;;  %v201_v3 = vld [vmem:[%s1109_s1] sm:$0xff] }
  0x20   :  { %1150 = vst [vmem:[#allocation24_spill] sm:$0xff] %v962_v54  ;;  %1151 = vst [vmem:[#allocation25_spill] sm:$0xff] %v964_v55  ;;  %v94_v57 = vadd.f32 %v964_v55, %v962_v54  ;;  %v182_v62 = vmax.f32 %v958_v52, %v960_v53  ;;  %v158_v63 = vmax.f32 %v962_v54, %v964_v55  ;;  %v202_v7 = vld [vmem:[%s1109_s1 + $0x8] sm:$0xff]  ;;  %v203_v16 = vld [vmem:[%s1109_s1 + $0x10] sm:$0xff] }
  0x21   :  { %v720_v11 = vpack.c.bf16 %v202_v7, %v201_v3  ;;  %v204_v17 = vld [vmem:[%s1109_s1 + $0x18] sm:$0xff]  ;;  %v232_v3 = vlaneseq }
  0x22   :  { %107 = vadd.xlane.f32.xlu1 %v106_v22  ;;  %v723_v22 = vpack.c.bf16 %v204_v17, %v203_v16 }
  0x23   :  { %83 = vadd.xlane.f32.xlu0 %v82_v23  ;;  %721 = vmatpush3.bf16.msra.mxu0 %v720_v11  ;;  %v205_v23 = vld [vmem:[%s1109_s1 + $0x20] sm:$0xff]  ;;  %v233_v11 = vand.u32 127, %v232_v3 }
  0x24   :  { %722 = vmatprep.subr.bf16.mxu0 %v795_v10 }
  0x25   :  { %v273_v37 = vadd.s32 4294967248, %v233_v11 }
  0x26   :  { %141 = vmax.xlane.f32.xlu1 %v140_v24  ;;  %v206_v24 = vld [vmem:[%s1109_s1 + $0x28] sm:$0xff] }
  0x27   :  { %138 = vmax.xlane.f32.xlu0 %v137_v25  ;;  %724 = vmatpush3.bf16.msra.mxu0 %v723_v22  ;;  %v726_v25 = vpack.c.bf16 %v206_v24, %v205_v23  ;;  %v1006_v22 = vshrl.u32 %v232_v3, 7  ;;  %v238_v23 = vadd.s32 4294967288, %v233_v11  ;;  %v245_v24 = vadd.s32 4294967280, %v233_v11 }
  0x28   :  { %725 = vmatprep.subr.bf16.mxu0 %v795_v10 }
  0x29   :  { %v241_v36 = vsub.s32 %v238_v23, %v1006_v22  ;;  %v236_v45 = vsub.s32 %v233_v11, %v1006_v22  ;;  %v248_v3 = vsub.s32 %v245_v24, %v1006_v22 }
  0x2a   :  { %165 = vmax.xlane.f32.xlu1 %v164_v26  ;;  %v207_v26 = vld [vmem:[%s1109_s1 + $0x30] sm:$0xff] }
  0x2b   :  { %162 = vmax.xlane.f32.xlu0 %v161_v27  ;;  %727 = vmatpush3.bf16.msra.mxu0 %v726_v25  ;;  %v208_v27 = vld [vmem:[%s1109_s1 + $0x38] sm:$0xff] }
  0x2c   :  { %728 = vmatprep.subr.bf16.mxu0 %v795_v10 }
  0x2e   :  { %110 = vadd.xlane.f32.xlu1 %v109_v32  ;;  %v729_v32 = vpack.c.bf16 %v208_v27, %v207_v26  ;;  %v252_v26 = vadd.s32 4294967272, %v233_v11  ;;  %v259_v27 = vadd.s32 4294967264, %v233_v11 }
  0x2f   :  { %86 = vadd.xlane.f32.xlu0 %v85_v33  ;;  %v797_v33 = vmov 0.0  }
  0x30   :  { %730 = vmatpush3.bf16.msra.mxu0 %v729_v32  ;;  %711 = vmatprep.mubr.msk.f32.mxu0 %vm796_vm0, %v797_v33  ;;  %v1012_v6 = vsub.s32 %v252_v26, %v1006_v22 }
  0x31   :  { %714 = vmatprep.subr.mxu1 %v797_v33  ;;  %716 = vmatprep.mubr.msk.f32.mxu1 %vm796_vm0, %v797_v33  ;;  %v266_v33 = vadd.s32 4294967256, %v233_v11 }
  0x32   :  { %168 = vmax.xlane.f32.xlu1 %v167_v34 }
  0x33   :  { %144 = vmax.xlane.f32.xlu0 %v143_v35  ;;  %v1018_v23 = vsub.s32 %v266_v33, %v1006_v22 }
  0x36   :  { %113 = vadd.xlane.f32.xlu1 %v112_v40 }
  0x37   :  { %89 = vadd.xlane.f32.xlu0 %v88_v41 }
  0x3a   :  { %171 = vmax.xlane.f32.xlu1 %v170_v42 }
  0x3b   :  { %147 = vmax.xlane.f32.xlu0 %v146_v43 }
  0x3e   :  { %116 = vadd.xlane.f32.xlu1 %v115_v48 }
  0x3f   :  { %92 = vadd.xlane.f32.xlu0 %v91_v49 }
  0x42   :  { %174 = vmax.xlane.f32.xlu1 %v173_v50 }
  0x43   :  { %150 = vmax.xlane.f32.xlu0 %v149_v51 }
  0x46   :  { %119 = vadd.xlane.f32.xlu1 %v118_v56 }
  0x47   :  { %95 = vadd.xlane.f32.xlu0 %v94_v57 }
  0x4a   :  { %177 = vmax.xlane.f32.xlu1 %v176_v58 }
  0x4b   :  { %153 = vmax.xlane.f32.xlu0 %v152_v59 }
  0x4e   :  { %180 = vmax.xlane.f32.xlu1 %v179_v60 }
  0x4f   :  { %156 = vmax.xlane.f32.xlu0 %v155_v61 }
  0x52   :  { %183 = vmax.xlane.f32.xlu1 %v182_v62 }
  0x53   :  { %159 = vmax.xlane.f32.xlu0 %v158_v63 }
  0xa3   :  { %v99_v34 = vpop.xlane.xlu1 %98 }
  0xa4   :  { %v75_v35 = vpop.xlane.xlu0 %74  ;;  %v129_v28 = vmul.f32 0.00390625, %v99_v34 }
  0xa5   :  { %v121_v53 = vmul.f32 0.00390625, %v75_v35  ;;  %v1015_v35 = vsub.s32 %v259_v27, %v1006_v22 }
  0xa7   :  { %v102_v40 = vpop.xlane.xlu1 %101 }
  0xa8   :  { %v78_v41 = vpop.xlane.xlu0 %77  ;;  %v130_v44 = vmul.f32 0.00390625, %v102_v40 }
  0xa9   :  { %v122_v52 = vmul.f32 0.00390625, %v78_v41 }
  0xab   :  { %v105_v42 = vpop.xlane.xlu1 %104 }
  0xac   :  { %v81_v43 = vpop.xlane.xlu0 %80  ;;  %v131_v5 = vmul.f32 0.00390625, %v105_v42 }
  0xad   :  { %v123_v40 = vmul.f32 0.00390625, %v81_v43 }
  0xaf   :  { %v108_v48 = vpop.xlane.xlu1 %107 }
  0xb0   :  { %v84_v49 = vpop.xlane.xlu0 %83  ;;  %v132_v34 = vmul.f32 0.00390625, %v108_v48 }
  0xb3   :  { %v142_v50 = vpop.xlane.xlu1 %141 }
  0xb4   :  { %v139_v51 = vpop.xlane.xlu0 %138  ;;  %v186_v19 = vadd.f32 %v142_v50, %v122_v52  ;;  %v1021_v52 = vsub.s32 %v273_v37, %v1006_v22  ;;  %v124_v50 = vmul.f32 0.00390625, %v84_v49 }
  0xb5   :  { %v185_v18 = vadd.f32 %v139_v51, %v121_v53  ;;  %v280_v53 = vadd.s32 4294967240, %v233_v11 }
  0xb6   :  { %v242_v24 = vrot.slane %v186_v19, %v241_v36 }
  0xb7   :  { %v166_v56 = vpop.xlane.xlu1 %165  ;;  %v237_v26 = vrot.slane %v185_v18, %v236_v45 }
  0xb8   :  { %v163_v57 = vpop.xlane.xlu0 %162  ;;  %v194_v13 = vadd.f32 %v166_v56, %v130_v44 }
  0xb9   :  { %v193_v51 = vadd.f32 %v163_v57, %v129_v28 }
  0xba   :  { %v294_v1 = vrot.slane %v194_v13, %v241_v36  ;;  %v244_v13 = vsel %vm243_vm1, %v242_v24, %v237_v26 }
  0xbb   :  { %v111_v58 = vpop.xlane.xlu1 %110  ;;  %v290_v43 = vrot.slane %v193_v51, %v236_v45 }
  0xbc   :  { %v87_v59 = vpop.xlane.xlu0 %86  ;;  %v133_v27 = vmul.f32 0.00390625, %v111_v58 }
  0xbd   :  { %v125_v33 = vmul.f32 0.00390625, %v87_v59 }
  0xbf   :  { %v169_v60 = vpop.xlane.xlu1 %168 }
  0xc0   :  { %v145_v61 = vpop.xlane.xlu0 %144  ;;  %v195_v12 = vadd.f32 %v169_v60, %v131_v5 }
  0xc1   :  { %v187_v54 = vadd.f32 %v145_v61, %v123_v40 }
  0xc2   :  { %v299_v57 = vrot.slane %v195_v12, %v248_v3  ;;  %v295_v12 = vsel %vm243_vm1, %v294_v1, %v290_v43 }
  0xc3   :  { %v114_v62 = vpop.xlane.xlu1 %113  ;;  %v249_v58 = vrot.slane %v187_v54, %v248_v3 }
  0xc4   :  { %v90_v63 = vpop.xlane.xlu0 %89  ;;  %v134_v42 = vmul.f32 0.00390625, %v114_v62  ;;  %v283_v62 = vsub.s32 %v280_v53, %v1006_v22 }
  0xc5   :  { %v126_v37 = vmul.f32 0.00390625, %v90_v63 }
  0xc7   :  { %v172_v7 = vpop.xlane.xlu1 %171 }
  0xc8   :  { %v148_v10 = vpop.xlane.xlu0 %147  ;;  %v196_v44 = vadd.f32 %v172_v7, %v132_v34 }
  0xc9   :  { %v188_v0 = vadd.f32 %v148_v10, %v124_v50  ;;  %v300_v10 = vsel %vm250_vm2, %v299_v57, %v295_v12 }
  0xca   :  { %v304_v59 = vrot.slane %v196_v44, %v1012_v6 }
  0xcb   :  { %v117_v16 = vpop.xlane.xlu1 %116  ;;  %v256_v36 = vrot.slane %v188_v0, %v1012_v6  ;;  %v251_v0 = vsel %vm250_vm2, %v249_v58, %v244_v13 }
  0xcc   :  { %v93_v17 = vpop.xlane.xlu0 %92  ;;  %v135_v48 = vmul.f32 0.00390625, %v117_v16  ;;  %v305_v6 = vsel %vm257_vm3, %v304_v59, %v300_v10 }
  0xcd   :  { %v127_v19 = vmul.f32 0.00390625, %v93_v17 }
  0xcf   :  { %v175_v25 = vpop.xlane.xlu1 %174 }
  0xd0   :  { %v151_v32 = vpop.xlane.xlu0 %150  ;;  %v197_v11 = vadd.f32 %v175_v25, %v133_v27 }
  0xd1   :  { %v189_v49 = vadd.f32 %v151_v32, %v125_v33 }
  0xd2   :  { %v309_v45 = vrot.slane %v197_v11, %v1015_v35 }
  0xd3   :  { %v120_v29 = vpop.xlane.xlu1 %119 }
  0xd4   :  { %v96_v41 = vpop.xlane.xlu0 %95  ;;  %v136_v7 = vmul.f32 0.00390625, %v120_v29  ;;  %v258_v29 = vsel %vm257_vm3, %v256_v36, %v251_v0  ;;  %v562_v0 = vsub.s32 1, %v1006_v22 }
  0xd5   :  { %v128_v16 = vmul.f32 0.00390625, %v96_v41 }
  0xd7   :  { %v178_v55 = vpop.xlane.xlu1 %177 }
  0xd8   :  { %v154_v56 = vpop.xlane.xlu0 %153  ;;  %v198_v28 = vadd.f32 %v178_v55, %v134_v42  ;;  %v263_v55 = vrot.slane %v189_v49, %v1015_v35  ;;  %v310_v35 = vsel %vm264_vm4, %v309_v45, %v305_v6  ;;  %v676_v42 = vld [vmem:[%s1110_s2] ss:$0 sm:$0xff] }
  0xd9   :  { %v190_v18 = vadd.f32 %v154_v56, %v126_v37 }
  0xda   :  { %v314_v54 = vrot.slane %v198_v28, %v1018_v23  ;;  %v265_v41 = vsel %vm264_vm4, %v263_v55, %v258_v29 }
  0xdb   :  { %v181_v5 = vpop.xlane.xlu1 %180  ;;  %v270_v17 = vrot.slane %v190_v18, %v1018_v23 }
  0xdc   :  { %v199_v60 = vadd.f32 %v181_v5, %v135_v48  ;;  %v157_v61 = vpop.xlane.xlu0 %156  ;;  %v315_v23 = vsel %vm271_vm5, %v314_v54, %v310_v35 }
  0xdd   :  { %v191_v63 = vadd.f32 %v157_v61, %v127_v19  ;;  %v272_v50 = vsel %vm271_vm5, %v270_v17, %v265_v41  ;;  %v433_v19 = vld [vmem:[%s1113_s5] sm:$0xf]  ;;  %v527_v17 = vsub.s32 0, %v1006_v22 }
  0xde   :  { %v319_v25 = vrot.slane %v199_v60, %v1021_v52  ;;  %715 = vmatpush3.msk.msra.mxu1 %vm445_vm11, %v433_v19  ;;  %v678_v60 = vld [vmem:[%s1111_s3] ss:$0 sm:$0xff]  ;;  %s798_s3 = smov [#allocation5]  }
  0xdf   :  { %v184_v32 = vpop.xlane.xlu1 %183  ;;  %v277_v3 = vrot.slane %v191_v63, %v1021_v52  ;;  %v680_v63 = vld [vmem:[%s1114_s6] ss:$0 sm:$0xff] }
  0xe0   :  { %v200_v1 = vadd.f32 %v184_v32, %v136_v7  ;;  %v160_v53 = vpop.xlane.xlu0 %159  ;;  %v320_v51 = vsel %vm278_vm6, %v319_v25, %v315_v23 }
  0xe1   :  { %v192_v40 = vadd.f32 %v160_v53, %v128_v16  ;;  %v279_v52 = vsel %vm278_vm6, %v277_v3, %v272_v50 }
  0xe2   :  { %v324_v34 = vrot.slane %v200_v1, %v283_v62 }
  0xe3   :  { %v284_v24 = vrot.slane %v192_v40, %v283_v62  ;;  %v679_v62 = vld [vmem:[%s1112_s4] ss:$0 sm:$0xff]  ;;  %s664_s4 = sshll.u32 %s798_s3, 4  ;;  %s665_s4 = int_to_ptr.vmem [resolvable:$true] %s664_s4 }
  0xe4   :  { %v325_v26 = vsel %vm285_vm7, %v324_v34, %v320_v51  ;;  %s766_s6 = scalar_lea.vmem %s665_s4, 4096  ;;  %p771_p9 = scmp.lt.s32.totalorder %s665_s4, %s665_s4 }
  0xe5   :  { %v286_v27 = vsel %vm285_vm7, %v284_v24, %v279_v52  ;;  %p767_p8 = scmp.ne.s32.totalorder %s665_s4, %s766_s6  ;;  %p772_p10 = scmp.lt.s32.totalorder %s766_s6, %s766_s6 }
  0xe6   :  { %v327_v33 = vsel %vm326_vm8, %v325_v26, %v286_v27  ;;  %v1152_v26 = vld [vmem:[#allocation8_spill] sm:$0xff] }
  0xe7   :  { %712 = vmatmul.mubr.msk.f32.vlgmr.msra.gmra.mrb[0].mxu0 %vm328_vm9, %v327_v33  ;;  %v1153_v33 = vld [vmem:[#allocation9_spill] sm:$0xff]  ;;  %p773_p11 = por %p772_p10, %p771_p9 }
  0xe9   :  { %p774_p12 = pnand %p773_p11, %p767_p8 }
 0x1ba   :  { %v397_v44 = vpop.f32.mrb[0].mxu0 }
 0x1bb   :  { %v398_v56 = vadd.f32 %v676_v42, %v397_v44  ;;  %v713_v37 = vpop.f32.mrb[1].mxu0  ;;  %v1155_v44 = vld [vmem:[#allocation25_spill] sm:$0xff] }
 0x1bc   :  { %v1156_v37 = vld [vmem:[#allocation12_spill] sm:$0xff] }
 0x1bd   :  { %v402_v11 = vsel %vm401_vm10, %v398_v56, 0.0 }
 0x1be   :  { %403 = vadd.xlane.f32.xlu0 %v402_v11 }
 0x24b   :  { %v404_v43 = vpop.xlane.xlu0 %403 }
 0x24c   :  { %v406_v48 = vmul.f32 0.25, %v404_v43  ;;  %v1157_v43 = vld [vmem:[#allocation13_spill] sm:$0xff] }
 0x24e   :  { %v407_v49 = vsub.f32 %v398_v56, %v406_v48 }
 0x250   :  { %v408_v28 = vmul.f32 %v407_v49, %v407_v49 }
 0x252   :  { %v409_v57 = vsel %vm401_vm10, %v408_v28, 0.0 }
 0x253   :  { %410 = vadd.xlane.f32.xlu1 %v409_v57  ;;  %v1159_v57 = vld [vmem:[#allocation11_spill] sm:$0xff] }
 0x2e0   :  { %v411_v18 = vpop.xlane.xlu1 %410 }
 0x2e1   :  { %v412_v5 = vmul.f32 0.25, %v411_v18  ;;  %v1160_v18 = vld [vmem:[#allocation16_spill] sm:$0xff] }
 0x2e3   :  { %v413_v58 = vadd.f32 1e-05, %v412_v5 }
 0x2e5   :  { %738 = vrsqrt.f32 %v413_v58  ;;  %v1161_v58 = vld [vmem:[#allocation17_spill] sm:$0xff] }
 0x2ef   :  { %v739_v59 = vpop.eup %738 }
 0x2f0   :  { %v415_v61 = vmul.f32 %v739_v59, %v407_v49  ;;  %v1158_v49 = vld [vmem:[#allocation10_spill] sm:$0xff] }
 0x2f2   :  { %v423_v13 = vmul.f32 %v678_v60, %v415_v61 }
 0x2f4   :  { %v431_v36 = vadd.f32 %v679_v62, %v423_v13  ;;  %v1162_v62 = vld [vmem:[#allocation14_spill] sm:$0xff] }
 0x2f6   :  { %v432_v45 = vmax.f32 %v431_v36, 0.0  ;;  %v1163_v36 = vld [vmem:[#allocation15_spill] sm:$0xff] }
 0x2f8   :  { %717 = vmatmul.mubr.msk.f32.vlgmr.msra.gmra.mrb[0].mxu1 %vm441_vm12, %v432_v45 }
 0x3cb   :  { %v515_v12 = vpop.f32.mrb[0].mxu1 }
 0x3cc   :  { %v516_v55 = vadd.f32 %v680_v63, %v515_v12  ;;  %v718_v7 = vpop.f32.mrb[1].mxu1  ;;  %v1164_v63 = vld [vmem:[#allocation20_spill] sm:$0xff] }
 0x3ce   :  { %v683_v54 = vmul.f32 -1.442695, %v516_v55  ;;  %v1165_v55 = vld [vmem:[#allocation21_spill] sm:$0xff] }
 0x3d0   :  { %740 = vpow2.f32 %v683_v54 }
 0x3da   :  { %v741_v10 = vpop.eup %740 }
 0x3db   :  { %v522_v16 = vadd.f32 1.0, %v741_v10  ;;  %v1166_v10 = vld [vmem:[#allocation18_spill] sm:$0xff] }
 0x3dd   :  { %742 = vrcp.f32 %v522_v16 }
 0x3e7   :  { %v743_v25 = vpop.eup %742 }
 0x3e8   :  { %v528_v32 = vrot.slane %v743_v25, %v527_v17  ;;  %v563_v6 = vrot.slane %v743_v25, %v562_v0  ;;  %v1167_v17 = vld [vmem:[#allocation19_spill] sm:$0xff]  ;;  %v1168_v0 = vld [vmem:[#allocation22_spill] sm:$0xff] }
 0x3ea   :  { %534 = vbcast.lane.b32.xlu1 %v528_v32, 264  ;;  %530 = vbcast.lane.b32.xlu0 %v528_v32, 256 }
 0x3ee   :  { %538 = vbcast.lane.b32.xlu1 %v528_v32, 272  ;;  %546 = vbcast.lane.b32.xlu0 %v528_v32, 288 }
 0x3f2   :  { %542 = vbcast.lane.b32.xlu1 %v528_v32, 280  ;;  %554 = vbcast.lane.b32.xlu0 %v528_v32, 304 }
 0x3f6   :  { %550 = vbcast.lane.b32.xlu1 %v528_v32, 296  ;;  %565 = vbcast.lane.b32.xlu0 %v563_v6, 256 }
 0x3fa   :  { %558 = vbcast.lane.b32.xlu1 %v528_v32, 312  ;;  %573 = vbcast.lane.b32.xlu0 %v563_v6, 272 }
 0x3fe   :  { %569 = vbcast.lane.b32.xlu1 %v563_v6, 264  ;;  %581 = vbcast.lane.b32.xlu0 %v563_v6, 288 }
 0x402   :  { %577 = vbcast.lane.b32.xlu1 %v563_v6, 280  ;;  %589 = vbcast.lane.b32.xlu0 %v563_v6, 304 }
 0x406   :  { %585 = vbcast.lane.b32.xlu1 %v563_v6, 296 }
 0x40a   :  { %593 = vbcast.lane.b32.xlu1 %v563_v6, 312 }
 0x45c   :  { %v535_v3 = vpop.permute.xlu1 %534  ;;  %v531_v1 = vpop.permute.xlu0 %530 }
 0x45d   :  { %v597_v53 = vmul.f32 %v535_v3, %v870_v8  ;;  %v598_v29 = vmul.f32 %v535_v3, %v872_v9  ;;  %v595_v22 = vmul.f32 %v531_v1, %v858_v2  ;;  %v596_v35 = vmul.f32 %v531_v1, %v862_v4  ;;  %v1169_v3 = vld [vmem:[#allocation23_spill] sm:$0xff] }
 0x45f   :  { %629 = vst [vmem:[#allocation5 + $0x10] sm:$0xff] %v597_v53  ;;  %630 = vst [vmem:[#allocation5 + $0x18] sm:$0xff] %v598_v29 }
 0x460   :  { %627 = vst [vmem:[#allocation5] sm:$0xff] %v595_v22  ;;  %628 = vst [vmem:[#allocation5 + $0x8] sm:$0xff] %v596_v35  ;;  %v539_v40 = vpop.permute.xlu1 %538  ;;  %v547_v41 = vpop.permute.xlu0 %546 }
 0x461   :  { %v599_v23 = vmul.f32 %v539_v40, %v882_v14  ;;  %v600_v34 = vmul.f32 %v539_v40, %v884_v15  ;;  %v603_v50 = vmul.f32 %v547_v41, %v914_v30  ;;  %v604_v8 = vmul.f32 %v547_v41, %v916_v31 }
 0x463   :  { %631 = vst [vmem:[#allocation5 + $0x20] sm:$0xff] %v599_v23  ;;  %632 = vst [vmem:[#allocation5 + $0x28] sm:$0xff] %v600_v34 }
 0x464   :  { %635 = vst [vmem:[#allocation5 + $0x40] sm:$0xff] %v603_v50  ;;  %636 = vst [vmem:[#allocation5 + $0x48] sm:$0xff] %v604_v8  ;;  %v543_v2 = vpop.permute.xlu1 %542  ;;  %v555_v4 = vpop.permute.xlu0 %554 }
 0x465   :  { %v601_v9 = vmul.f32 %v543_v2, %v894_v20  ;;  %v602_v51 = vmul.f32 %v543_v2, %v896_v21  ;;  %v607_v24 = vmul.f32 %v555_v4, %v946_v46  ;;  %v608_v14 = vmul.f32 %v555_v4, %v948_v47  ;;  %v1154_v47 = vld [vmem:[#allocation24_spill] sm:$0xff] }
 0x467   :  { %633 = vst [vmem:[#allocation5 + $0x30] sm:$0xff] %v601_v9  ;;  %634 = vst [vmem:[#allocation5 + $0x38] sm:$0xff] %v602_v51 }
 0x468   :  { %639 = vst [vmem:[#allocation5 + $0x60] sm:$0xff] %v607_v24  ;;  %640 = vst [vmem:[#allocation5 + $0x68] sm:$0xff] %v608_v14  ;;  %v551_v15 = vpop.permute.xlu1 %550  ;;  %v566_v30 = vpop.permute.xlu0 %565 }
 0x469   :  { %v605_v31 = vmul.f32 %v551_v15, %v930_v38  ;;  %v606_v52 = vmul.f32 %v551_v15, %v932_v39  ;;  %v611_v27 = vmul.f32 %v566_v30, %v1152_v26  ;;  %v612_v20 = vmul.f32 %v566_v30, %v1153_v33 }
 0x46b   :  { %637 = vst [vmem:[#allocation5 + $0x50] sm:$0xff] %v605_v31  ;;  %638 = vst [vmem:[#allocation5 + $0x58] sm:$0xff] %v606_v52 }
 0x46c   :  { %643 = vst [vmem:[#allocation5 + $0x80] sm:$0xff] %v611_v27  ;;  %644 = vst [vmem:[#allocation5 + $0x88] sm:$0xff] %v612_v20  ;;  %v559_v21 = vpop.permute.xlu1 %558  ;;  %v574_v46 = vpop.permute.xlu0 %573 }
 0x46d   :  { %v609_v42 = vmul.f32 %v559_v21, %v1154_v47  ;;  %v610_v56 = vmul.f32 %v559_v21, %v1155_v44  ;;  %v615_v11 = vmul.f32 %v574_v46, %v1156_v37  ;;  %v616_v38 = vmul.f32 %v574_v46, %v1157_v43 }
 0x46f   :  { %641 = vst [vmem:[#allocation5 + $0x70] sm:$0xff] %v609_v42  ;;  %642 = vst [vmem:[#allocation5 + $0x78] sm:$0xff] %v610_v56 }
 0x470   :  { %647 = vst [vmem:[#allocation5 + $0xa0] sm:$0xff] %v615_v11  ;;  %648 = vst [vmem:[#allocation5 + $0xa8] sm:$0xff] %v616_v38  ;;  %v570_v39 = vpop.permute.xlu1 %569  ;;  %v582_v48 = vpop.permute.xlu0 %581 }
 0x471   :  { %v613_v28 = vmul.f32 %v570_v39, %v1158_v49  ;;  %v614_v19 = vmul.f32 %v570_v39, %v1159_v57  ;;  %v619_v5 = vmul.f32 %v582_v48, %v1160_v18  ;;  %v620_v59 = vmul.f32 %v582_v48, %v1161_v58 }
 0x473   :  { %645 = vst [vmem:[#allocation5 + $0x90] sm:$0xff] %v613_v28  ;;  %646 = vst [vmem:[#allocation5 + $0x98] sm:$0xff] %v614_v19 }
 0x474   :  { %651 = vst [vmem:[#allocation5 + $0xc0] sm:$0xff] %v619_v5  ;;  %652 = vst [vmem:[#allocation5 + $0xc8] sm:$0xff] %v620_v59  ;;  %v578_v60 = vpop.permute.xlu1 %577  ;;  %v590_v61 = vpop.permute.xlu0 %589 }
 0x475   :  { %v617_v13 = vmul.f32 %v578_v60, %v1162_v62  ;;  %v618_v45 = vmul.f32 %v578_v60, %v1163_v36  ;;  %v623_v12 = vmul.f32 %v590_v61, %v1164_v63  ;;  %v624_v7 = vmul.f32 %v590_v61, %v1165_v55 }
 0x477   :  { %649 = vst [vmem:[#allocation5 + $0xb0] sm:$0xff] %v617_v13  ;;  %650 = vst [vmem:[#allocation5 + $0xb8] sm:$0xff] %v618_v45 }
 0x478   :  { %655 = vst [vmem:[#allocation5 + $0xe0] sm:$0xff] %v623_v12  ;;  %656 = vst [vmem:[#allocation5 + $0xe8] sm:$0xff] %v624_v7  ;;  %v586_v54 = vpop.permute.xlu1 %585 }
 0x479   :  { %v621_v16 = vmul.f32 %v586_v54, %v1166_v10  ;;  %v622_v25 = vmul.f32 %v586_v54, %v1167_v17 }
 0x47b   :  { %653 = vst [vmem:[#allocation5 + $0xd0] sm:$0xff] %v621_v16  ;;  %654 = vst [vmem:[#allocation5 + $0xd8] sm:$0xff] %v622_v25 }
 0x47c   :  { %v594_v32 = vpop.permute.xlu1 %593 }
 0x47d   :  { %v625_v6 = vmul.f32 %v594_v32, %v1168_v0  ;;  %v626_v1 = vmul.f32 %v594_v32, %v1169_v3 }
 0x47f   :  { %657 = vst [vmem:[#allocation5 + $0xf0] sm:$0xff] %v625_v6  ;;  %658 = vst [vmem:[#allocation5 + $0xf8] sm:$0xff] %v626_v1 }
 0x480   :  { %777 = shalt.err (!%p774_p12)
}
 0x481   :  { %s778_s17 = scalar_lea.hbm %s1115_s7, 4096 }
 0x482   :  { %p779_p13 = scmp.ne.s32.totalorder %s1115_s7, %s778_s17  ;;  %p782_p0 = scmp.lt.u32.totalorder %s778_s17, %s1115_s7 }
 0x484   :  { %p784_p1 = pnand %p782_p0, %p779_p13 }
 0x486   :  { %787 = shalt.err (!%p784_p1)
}
 0x487   :  { %670 = dma.vmem_to_hbm [thread:$0]  %s665_s4, 4096, %s1115_s7, [#allocation4], %s793_s11, %s793_s11, %s794_s12  }
 0x488   :  { %790 = dma.done.wait [#allocation4], 4096  }
 0x489   :  { %791 = vsyncadd [#allocation4], 4294963200 }
 0x48a   :  { %674 = vsyncpa [#allocation3], 1 }
 0x48b   :  { %675 = vsyncpa [#allocation4], 1 }

</bundles_post_ra>
